<compile_context>
chip_gen: v7x
topology: tpu7x:2x2x1
jax: 0.10.0
libtpu: 0.0.40
codegen_flags: <defaults>
</compile_context>

<pallas_src>
import functools

import jax
import jax.numpy as jnp
from jax import lax
from jax.experimental import pallas as pl
from jax.experimental.pallas import tpu as pltpu

EPS = 1e-12


def _f1_counts_kernel(x_ref, t_ref, out_ref, tp_acc, tc_acc, pc_acc, *,
                      num_classes, n_valid, tile_n):
    """Accumulate per-class TP / true-count / pred-count for one sample tile."""
    p = pl.program_id(0)            # parallel (core) axis
    t = pl.program_id(1)            # reduction axis over sample tiles
    n_t = pl.num_programs(1)

    @pl.when(t == 0)
    def _():
        tp_acc[...] = jnp.zeros_like(tp_acc)
        tc_acc[...] = jnp.zeros_like(tc_acc)
        pc_acc[...] = jnp.zeros_like(pc_acc)

    # Natural-layout tile (tile_n, C); transpose on the idle XLU so every
    # subsequent per-sample op is lane-dense (samples on the 128 lanes).
    x = jnp.transpose(x_ref[...])                    # (C, tile_n) f32 logits
    labels = t_ref[...]                              # (1, tile_n) i32 labels
    C = x.shape[0]
    K = num_classes
    sentinel = jnp.int32(max(K, C) + 1)              # never matches a real class

    # argmax over classes (first index attaining the max, like torch.argmax).
    xmax = jnp.max(x, axis=0, keepdims=True)                         # (1, tile_n)
    row_c = lax.broadcasted_iota(jnp.int32, x.shape, 0)
    pred = jnp.min(jnp.where(x >= xmax, row_c, jnp.int32(C)),
                   axis=0, keepdims=True)                            # (1, tile_n)

    # Fold validity (tail-tile / clamped-block garbage) into the (1, tile_n)
    # index vectors once instead of AND-ing masks on the (K, tile_n) one-hots.
    g = (p * n_t + t) * tile_n + lax.broadcasted_iota(jnp.int32, (1, tile_n), 1)
    valid = g < n_valid
    pred = jnp.where(valid, pred, sentinel)
    lab = jnp.where(valid, labels, sentinel)
    hit = jnp.where(pred == lab, lab, sentinel)      # true class where correct

    # Per-class streaming counts (CM diagonal + both marginals).
    # TODO(synk): for num_classes >= ~64 this one-hot histogram costs ~8*K
    # elem-ops/sample and becomes VALU-bound; switch to an MXU one-hot matvec.
    cls = lax.broadcasted_iota(jnp.int32, (K, tile_n), 0)            # (K, tile_n)
    tp_acc[...] += jnp.sum((cls == hit).astype(jnp.float32), axis=1, keepdims=True)
    tc_acc[...] += jnp.sum((cls == lab).astype(jnp.float32), axis=1, keepdims=True)
    pc_acc[...] += jnp.sum((cls == pred).astype(jnp.float32), axis=1, keepdims=True)

    @pl.when(t == n_t - 1)
    def _():
        out_ref[0, :, 0:1] = tp_acc[...]
        out_ref[0, :, 1:2] = tc_acc[...]
        out_ref[0, :, 2:3] = pc_acc[...]


def _tpu_kind():
    try:
        return jax.devices()[0].device_kind.lower()
    except Exception:
        return ""


def f1_score(y_pred, y_true, num_classes, average="macro", tile_n=None):
    if average not in ("macro", "micro"):
        raise ValueError(
            "Average type not recognized. Please choose 'macro' or 'micro'.")
    y_pred = jnp.asarray(y_pred, jnp.float32)
    assert y_pred.ndim == 2
    N, C = y_pred.shape
    y_true = jnp.asarray(y_true).astype(jnp.int32).reshape(-1)
    assert y_true.shape[0] == N
    K = int(num_classes)

    kind = _tpu_kind()
    is_v7 = "v7" in kind
    two_cores = is_v7 or ("v4" in kind) or ("v5p" in kind)
    # Generation-aware scoped-VMEM budget: v7x has only 64 MiB physical VMEM.
    vmem_limit = (32 << 20) if is_v7 else (64 << 20)

    # ---- sample-tile width: multiple of 128 lanes, sized so the worst-case
    # (lane-padded) double-buffered logits tiles use ~half the VMEM budget,
    # amortizing the per-grid-step overhead. ----
    if tile_n is None:
        padded_c = ((max(C, 1) + 127) // 128) * 128   # worst-case lane padding
        tile_n = (vmem_limit // 2) // (2 * padded_c * 4)
        tile_n = max(512, min(32768, (tile_n // 128) * 128))
    tile_n = min(tile_n, max(128, ((N + 127) // 128) * 128))
    assert tile_n % 128 == 0

    # Tiny inputs (smaller than one tile) are padded up to a full tile (cheap);
    # large inputs stream unpadded — the overhanging tail block holds garbage
    # that the in-kernel n_valid mask neutralizes.
    if N < tile_n:
        y_pred = jnp.pad(y_pred, ((0, tile_n - N), (0, 0)))
        y_true = jnp.pad(y_true, (0, tile_n - N))
    n_rows = y_pred.shape[0]
    labels = y_true.reshape(1, n_rows)            # free reshape, lane-dense labels
    # TODO(synk): cast labels to int8/int16 here (~5-8% less HBM traffic for
    # small C) once narrow-int (1, n) block layouts are verified to lower.

    n_blocks = -(-n_rows // tile_n)
    P = 2 if (two_cores and n_blocks >= 2) else 1  # megacore split only on 2-TC parts
    T = -(-n_blocks // P)
    last = n_blocks - 1

    kernel = functools.partial(_f1_counts_kernel, num_classes=K, n_valid=N,
                               tile_n=tile_n)
    counts = pl.pallas_call(
        kernel,
        out_shape=jax.ShapeDtypeStruct((P, K, 3), jnp.float32),
        grid_spec=pltpu.PrefetchScalarGridSpec(
            num_scalar_prefetch=0,
            grid=(P, T),
            in_specs=[
                pl.BlockSpec((tile_n, C),
                             lambda p, t, T=T, last=last:
                                 (jnp.minimum(p * T + t, last), 0)),
                pl.BlockSpec((1, tile_n),
                             lambda p, t, T=T, last=last:
                                 (0, jnp.minimum(p * T + t, last))),
            ],
            out_specs=pl.BlockSpec((1, K, 3), lambda p, t: (p, 0, 0)),
            scratch_shapes=[pltpu.VMEM((K, 1), jnp.float32)] * 3,
        ),
        compiler_params=pltpu.CompilerParams(
            dimension_semantics=("parallel", "arbitrary"),
            vmem_limit_bytes=vmem_limit),
        cost_estimate=pl.CostEstimate(
            flops=n_rows * (3 * C + 10 * K),
            transcendentals=0,
            bytes_accessed=n_rows * C * 4 + n_rows * 4 + P * K * 3 * 4),
    )(y_pred, labels)

    # Tiny O(K) epilogue: combine per-core partial counts and form F1
    # (mirrors the reference: precision = diag/cm.sum(1), recall = diag/cm.sum(0)).
    totals = jnp.sum(counts, axis=0)          # (K, 3)
    tp = totals[:, 0]
    tc = totals[:, 1]
    pc = totals[:, 2]
    precision = tp / (tc + EPS)
    recall = tp / (pc + EPS)
    f1 = 2.0 * precision * recall / (precision + recall + EPS)
    if average == "macro":
        return jnp.mean(f1)
    return jnp.sum(tp) / jnp.sum(tc)


def _f1_ref(y_pred, y_true, num_classes, average="macro"):
    """Pure-JAX reference mirroring the PyTorch module (for sanity checking)."""
    pred = jnp.argmax(y_pred, axis=1)
    cm = jnp.zeros((num_classes, num_classes), jnp.float32)
    cm = cm.at[y_true.astype(jnp.int32), pred].add(1.0)
    diag = jnp.diag(cm)
    precision = diag / (cm.sum(1) + EPS)
    recall = diag / (cm.sum(0) + EPS)
    f1 = 2 * precision * recall / (precision + recall + EPS)
    if average == "macro":
        return jnp.mean(f1)
    return jnp.sum(diag) / jnp.sum(cm)


if __name__ == "__main__":
    key = jax.random.PRNGKey(0)
    k1, k2, k3, k4, k5, k6 = jax.random.split(key, 6)

    # Case 1: batch of 16 samples, 8 classes (single padded tile).
    N, C = 16, 8
    y_pred = jax.random.normal(k1, (N, C), dtype=jnp.float32)
    y_true = jax.random.randint(k2, (N,), 0, C, dtype=jnp.int32)
    out_macro = f1_score(y_pred, y_true, num_classes=C, average="macro")
    out_micro = f1_score(y_pred, y_true, num_classes=C, average="micro")
    jax.block_until_ready((out_macro, out_micro))
    assert abs(float(out_macro) - float(_f1_ref(y_pred, y_true, C, "macro"))) < 1e-5
    assert abs(float(out_micro) - float(_f1_ref(y_pred, y_true, C, "micro"))) < 1e-5

    # Case 2: multi-tile accumulation, un-padded partial tail block (300 = 2*128+44),
    # index-map clamping and (on 2-TC parts) the 2-way parallel split.
    N2, C2 = 300, 5
    y_pred2 = jax.random.normal(k3, (N2, C2), dtype=jnp.float32)
    y_true2 = jax.random.randint(k4, (N2,), 0, C2, dtype=jnp.int32)
    m2 = f1_score(y_pred2, y_true2, num_classes=C2, average="macro", tile_n=128)
    u2 = f1_score(y_pred2, y_true2, num_classes=C2, average="micro", tile_n=128)
    jax.block_until_ready((m2, u2))
    assert abs(float(m2) - float(_f1_ref(y_pred2, y_true2, C2, "macro"))) < 1e-5
    assert abs(float(u2) - float(_f1_ref(y_pred2, y_true2, C2, "micro"))) < 1e-5

    # Case 3: default (VMEM-budgeted) tile path, exact 128-multiple, no padding.
    N3, C3 = 1024, 8
    y_pred3 = jax.random.normal(k5, (N3, C3), dtype=jnp.float32)
    y_true3 = jax.random.randint(k6, (N3,), 0, C3, dtype=jnp.int32)
    m3 = f1_score(y_pred3, y_true3, num_classes=C3, average="macro")
    u3 = f1_score(y_pred3, y_true3, num_classes=C3, average="micro")
    jax.block_until_ready((m3, u3))
    assert abs(float(m3) - float(_f1_ref(y_pred3, y_true3, C3, "macro"))) < 1e-5
    assert abs(float(u3) - float(_f1_ref(y_pred3, y_true3, C3, "micro"))) < 1e-5

    print("KERNEL_OK")
</pallas_src>

<mosaic_0001>
module attributes {stable_mosaic.version = 11 : i64} {
  func.func @_f1_counts_kernel(%arg0: i32, %arg1: i32, %arg2: memref<128x8xf32, #tpu.memory_space<vmem>>, %arg3: memref<1x128xi32, #tpu.memory_space<vmem>>, %arg4: memref<1x8x3xf32, #tpu.memory_space<vmem>>, %arg5: memref<8x1xf32, #tpu.memory_space<vmem>>, %arg6: memref<8x1xf32, #tpu.memory_space<vmem>>, %arg7: memref<8x1xf32, #tpu.memory_space<vmem>>) attributes {dimension_semantics = [#tpu.dimension_semantics<parallel>, #tpu.dimension_semantics<arbitrary>], iteration_bounds = array<i64: 1, 1>, scalar_prefetch = 0 : i64, scratch_operands = 3 : i64, tpu.core_type = #tpu.core_type<tc>, window_params = [{transform_indices = @transform_0, window_bounds = array<i64: 128, 8>}, {transform_indices = @transform_1, window_bounds = array<i64: 1, 128>}, {transform_indices = @transform_2, window_bounds = array<i64: 1, 8, 3>}]} {
    %c0_i32 = arith.constant 0 : i32
    %0 = arith.cmpi eq, %arg1, %c0_i32 : i32
    %1 = arith.extui %0 : i1 to i32
    %c0_i32_0 = arith.constant 0 : i32
    %2 = arith.cmpi ne, %1, %c0_i32_0 : i32
    scf.if %2 {
      %cst_24 = arith.constant 0.000000e+00 : f32
      %61 = vector.broadcast %cst_24 : f32 to vector<8x1xf32>
      %c0_25 = arith.constant 0 : index
      %c0_26 = arith.constant 0 : index
      %62 = vector.load %arg5[%c0_25, %c0_26] : memref<8x1xf32, #tpu.memory_space<vmem>>, vector<8x1xf32>
      tpu.vector_store %arg5[%c0_25, %c0_26], %61 {strides = array<i32>} : memref<8x1xf32, #tpu.memory_space<vmem>>, vector<8x1xf32>,
      %cst_27 = arith.constant 0.000000e+00 : f32
      %63 = vector.broadcast %cst_27 : f32 to vector<8x1xf32>
      %c0_28 = arith.constant 0 : index
      %c0_29 = arith.constant 0 : index
      %64 = vector.load %arg6[%c0_28, %c0_29] : memref<8x1xf32, #tpu.memory_space<vmem>>, vector<8x1xf32>
      tpu.vector_store %arg6[%c0_28, %c0_29], %63 {strides = array<i32>} : memref<8x1xf32, #tpu.memory_space<vmem>>, vector<8x1xf32>,
      %cst_30 = arith.constant 0.000000e+00 : f32
      %65 = vector.broadcast %cst_30 : f32 to vector<8x1xf32>
      %c0_31 = arith.constant 0 : index
      %c0_32 = arith.constant 0 : index
      %66 = vector.load %arg7[%c0_31, %c0_32] : memref<8x1xf32, #tpu.memory_space<vmem>>, vector<8x1xf32>
      tpu.vector_store %arg7[%c0_31, %c0_32], %65 {strides = array<i32>} : memref<8x1xf32, #tpu.memory_space<vmem>>, vector<8x1xf32>,
    } else {
    }
    %c0 = arith.constant 0 : index
    %c0_1 = arith.constant 0 : index
    %3 = vector.load %arg2[%c0, %c0_1] : memref<128x8xf32, #tpu.memory_space<vmem>>, vector<128x8xf32>
    %4 = tpu.transpose %3, [1, 0] : vector<128x8xf32> -> vector<8x128xf32>
    %c0_2 = arith.constant 0 : index
    %c0_3 = arith.constant 0 : index
    %5 = vector.load %arg3[%c0_2, %c0_3] : memref<1x128xi32, #tpu.memory_space<vmem>>, vector<1x128xi32>
    %cst = arith.constant dense<0xFF800000> : vector<128xf32>
    %6 = vector.multi_reduction <maximumf>, %4, %cst [0] : vector<8x128xf32> to vector<128xf32>
    %7 = vector.shape_cast %6 : vector<128xf32> to vector<1x128xf32>
    %8 = tpu.iota {dimensions = array<i32: 0>} : vector<8x128xi32>
    %9 = vector.broadcast %7 : vector<1x128xf32> to vector<8x128xf32>
    %10 = arith.cmpf oge, %4, %9 : vector<8x128xf32>
    %c8_i32 = arith.constant 8 : i32
    %11 = vector.broadcast %c8_i32 : i32 to vector<8x128xi32>
    %12 = arith.select %10, %8, %11 : vector<8x128xi1>, vector<8x128xi32>
    %cst_4 = arith.constant dense<2147483647> : vector<128xi32>
    %13 = vector.multi_reduction <minsi>, %12, %cst_4 [0] : vector<8x128xi32> to vector<128xi32>
    %14 = vector.shape_cast %13 : vector<128xi32> to vector<1x128xi32>
    %c1_i32 = arith.constant 1 : i32
    %15 = arith.muli %arg0, %c1_i32 : i32
    %16 = arith.addi %15, %arg1 : i32
    %c128_i32 = arith.constant 128 : i32
    %17 = arith.muli %16, %c128_i32 : i32
    %18 = tpu.iota {dimensions = array<i32: 1>} : vector<1x128xi32>
    %19 = vector.broadcast %17 : i32 to vector<1x128xi32>
    %20 = arith.addi %19, %18 : vector<1x128xi32>
    %c16_i32 = arith.constant 16 : i32
    %21 = vector.broadcast %c16_i32 : i32 to vector<1x128xi32>
    %22 = arith.cmpi slt, %20, %21 : vector<1x128xi32>
    %c9_i32 = arith.constant 9 : i32
    %23 = vector.broadcast %c9_i32 : i32 to vector<1x128xi32>
    %24 = arith.select %22, %14, %23 : vector<1x128xi1>, vector<1x128xi32>
    %c9_i32_5 = arith.constant 9 : i32
    %25 = vector.broadcast %c9_i32_5 : i32 to vector<1x128xi32>
    %26 = arith.select %22, %5, %25 : vector<1x128xi1>, vector<1x128xi32>
    %27 = arith.cmpi eq, %24, %26 : vector<1x128xi32>
    %c9_i32_6 = arith.constant 9 : i32
    %28 = vector.broadcast %c9_i32_6 : i32 to vector<1x128xi32>
    %29 = arith.select %27, %26, %28 : vector<1x128xi1>, vector<1x128xi32>
    %30 = tpu.iota {dimensions = array<i32: 0>} : vector<8x128xi32>
    %c0_7 = arith.constant 0 : index
    %c0_8 = arith.constant 0 : index
    %31 = vector.load %arg5[%c0_7, %c0_8] : memref<8x1xf32, #tpu.memory_space<vmem>>, vector<8x1xf32>
    %32 = vector.broadcast %29 : vector<1x128xi32> to vector<8x128xi32>
    %33 = arith.cmpi eq, %30, %32 : vector<8x128xi32>
    %34 = arith.extui %33 : vector<8x128xi1> to vector<8x128xi32>
    %35 = arith.sitofp %34 : vector<8x128xi32> to vector<8x128xf32>
    %cst_9 = arith.constant dense<0.000000e+00> : vector<8xf32>
    %36 = vector.multi_reduction <add>, %35, %cst_9 [1] : vector<8x128xf32> to vector<8xf32>
    %37 = vector.shape_cast %36 : vector<8xf32> to vector<8x1xf32>
    %38 = arith.addf %31, %37 : vector<8x1xf32>
    %c0_10 = arith.constant 0 : index
    %c0_11 = arith.constant 0 : index
    %39 = vector.load %arg5[%c0_10, %c0_11] : memref<8x1xf32, #tpu.memory_space<vmem>>, vector<8x1xf32>
    tpu.vector_store %arg5[%c0_10, %c0_11], %38 {strides = array<i32>} : memref<8x1xf32, #tpu.memory_space<vmem>>, vector<8x1xf32>,
    %c0_12 = arith.constant 0 : index
    %c0_13 = arith.constant 0 : index
    %40 = vector.load %arg6[%c0_12, %c0_13] : memref<8x1xf32, #tpu.memory_space<vmem>>, vector<8x1xf32>
    %41 = vector.broadcast %26 : vector<1x128xi32> to vector<8x128xi32>
    %42 = arith.cmpi eq, %30, %41 : vector<8x128xi32>
    %43 = arith.extui %42 : vector<8x128xi1> to vector<8x128xi32>
    %44 = arith.sitofp %43 : vector<8x128xi32> to vector<8x128xf32>
    %cst_14 = arith.constant dense<0.000000e+00> : vector<8xf32>
    %45 = vector.multi_reduction <add>, %44, %cst_14 [1] : vector<8x128xf32> to vector<8xf32>
    %46 = vector.shape_cast %45 : vector<8xf32> to vector<8x1xf32>
    %47 = arith.addf %40, %46 : vector<8x1xf32>
    %c0_15 = arith.constant 0 : index
    %c0_16 = arith.constant 0 : index
    %48 = vector.load %arg6[%c0_15, %c0_16] : memref<8x1xf32, #tpu.memory_space<vmem>>, vector<8x1xf32>
    tpu.vector_store %arg6[%c0_15, %c0_16], %47 {strides = array<i32>} : memref<8x1xf32, #tpu.memory_space<vmem>>, vector<8x1xf32>,
    %c0_17 = arith.constant 0 : index
    %c0_18 = arith.constant 0 : index
    %49 = vector.load %arg7[%c0_17, %c0_18] : memref<8x1xf32, #tpu.memory_space<vmem>>, vector<8x1xf32>
    %50 = vector.broadcast %24 : vector<1x128xi32> to vector<8x128xi32>
    %51 = arith.cmpi eq, %30, %50 : vector<8x128xi32>
    %52 = arith.extui %51 : vector<8x128xi1> to vector<8x128xi32>
    %53 = arith.sitofp %52 : vector<8x128xi32> to vector<8x128xf32>
    %cst_19 = arith.constant dense<0.000000e+00> : vector<8xf32>
    %54 = vector.multi_reduction <add>, %53, %cst_19 [1] : vector<8x128xf32> to vector<8xf32>
    %55 = vector.shape_cast %54 : vector<8xf32> to vector<8x1xf32>
    %56 = arith.addf %49, %55 : vector<8x1xf32>
    %c0_20 = arith.constant 0 : index
    %c0_21 = arith.constant 0 : index
    %57 = vector.load %arg7[%c0_20, %c0_21] : memref<8x1xf32, #tpu.memory_space<vmem>>, vector<8x1xf32>
    tpu.vector_store %arg7[%c0_20, %c0_21], %56 {strides = array<i32>} : memref<8x1xf32, #tpu.memory_space<vmem>>, vector<8x1xf32>,
    %c0_i32_22 = arith.constant 0 : i32
    %58 = arith.cmpi eq, %arg1, %c0_i32_22 : i32
    %59 = arith.extui %58 : i1 to i32
    %c0_i32_23 = arith.constant 0 : i32
    %60 = arith.cmpi ne, %59, %c0_i32_23 : i32
    scf.if %60 {
      %c0_24 = arith.constant 0 : index
      %c0_25 = arith.constant 0 : index
      %61 = vector.load %arg5[%c0_24, %c0_25] : memref<8x1xf32, #tpu.memory_space<vmem>>, vector<8x1xf32>
      %c0_26 = arith.constant 0 : index
      %c0_27 = arith.constant 0 : index
      %c0_28 = arith.constant 0 : index
      %62 = vector.load %arg4[%c0_26, %c0_27, %c0_28] : memref<1x8x3xf32, #tpu.memory_space<vmem>>, vector<1x8x1xf32>
      %63 = vector.shape_cast %62 : vector<1x8x1xf32> to vector<8x1xf32>
      %64 = vector.shape_cast %61 : vector<8x1xf32> to vector<1x8x1xf32>
      tpu.vector_store %arg4[%c0_26, %c0_27, %c0_28], %64 {strides = array<i32>} : memref<1x8x3xf32, #tpu.memory_space<vmem>>, vector<1x8x1xf32>,
      %c0_29 = arith.constant 0 : index
      %c0_30 = arith.constant 0 : index
      %65 = vector.load %arg6[%c0_29, %c0_30] : memref<8x1xf32, #tpu.memory_space<vmem>>, vector<8x1xf32>
      %c0_31 = arith.constant 0 : index
      %c0_32 = arith.constant 0 : index
      %c1 = arith.constant 1 : index
      %66 = vector.load %arg4[%c0_31, %c0_32, %c1] : memref<1x8x3xf32, #tpu.memory_space<vmem>>, vector<1x8x1xf32>
      %67 = vector.shape_cast %66 : vector<1x8x1xf32> to vector<8x1xf32>
      %68 = vector.shape_cast %65 : vector<8x1xf32> to vector<1x8x1xf32>
      tpu.vector_store %arg4[%c0_31, %c0_32, %c1], %68 {strides = array<i32>} : memref<1x8x3xf32, #tpu.memory_space<vmem>>, vector<1x8x1xf32>,
      %c0_33 = arith.constant 0 : index
      %c0_34 = arith.constant 0 : index
      %69 = vector.load %arg7[%c0_33, %c0_34] : memref<8x1xf32, #tpu.memory_space<vmem>>, vector<8x1xf32>
      %c0_35 = arith.constant 0 : index
      %c0_36 = arith.constant 0 : index
      %c2 = arith.constant 2 : index
      %70 = vector.load %arg4[%c0_35, %c0_36, %c2] : memref<1x8x3xf32, #tpu.memory_space<vmem>>, vector<1x8x1xf32>
      %71 = vector.shape_cast %70 : vector<1x8x1xf32> to vector<8x1xf32>
      %72 = vector.shape_cast %69 : vector<8x1xf32> to vector<1x8x1xf32>
      tpu.vector_store %arg4[%c0_35, %c0_36, %c2], %72 {strides = array<i32>} : memref<1x8x3xf32, #tpu.memory_space<vmem>>, vector<1x8x1xf32>,
    } else {
    }
    return
  }
  func.func @transform_0(%arg0: i32, %arg1: i32) -> (i32, i32) {
    %c1_i32 = arith.constant 1 : i32
    %0 = arith.muli %arg0, %c1_i32 : i32
    %1 = arith.addi %0, %arg1 : i32
    %c0_i32 = arith.constant 0 : i32
    %2 = arith.minsi %1, %c0_i32 : i32
    %c0_i32_0 = arith.constant 0 : i32
    %c0_i32_1 = arith.constant 0 : i32
    return %2, %c0_i32_0 : i32, i32
  }
  func.func @transform_1(%arg0: i32, %arg1: i32) -> (i32, i32) {
    %c1_i32 = arith.constant 1 : i32
    %0 = arith.muli %arg0, %c1_i32 : i32
    %1 = arith.addi %0, %arg1 : i32
    %c0_i32 = arith.constant 0 : i32
    %2 = arith.minsi %1, %c0_i32 : i32
    %c0_i32_0 = arith.constant 0 : i32
    %c0_i32_1 = arith.constant 0 : i32
    return %c0_i32_0, %2 : i32, i32
  }
  func.func @transform_2(%arg0: i32, %arg1: i32) -> (i32, i32, i32) {
    %c0_i32 = arith.constant 0 : i32
    %c0_i32_0 = arith.constant 0 : i32
    %c0_i32_1 = arith.constant 0 : i32
    return %arg0, %c0_i32, %c0_i32_0 : i32, i32, i32
  }
}

</mosaic_0001>

<bundles_post_ra>
// kernel: tpu_custom_call.1
= control target key start
LH: loop header
LB: loop body
LE: loop exit
PB: predicated region body
PF: predicated region fallthrough
CT: control target
= control target key end

     0   :  { %7 = vsyncpa [#allocation6], 0  ;;  %s393_s0 = inlined_call_operand.hbm [shape: f32[128,8], index: 0, kind: input, shape index: {}]   ;;  %s394_s1 = inlined_call_operand.hbm [shape: s32[1,128], index: 1, kind: input, shape index: {}]   ;;  %s395_s2 = inlined_call_operand.hbm [shape: f32[1,8,3], index: 2, kind: output, shape index: {}]  }
   0x1   :  { %8 = vsyncpa [#allocation9], 0 }
   0x2   :  { %9 = vsyncpa [#allocation7], 0  ;;  %s298_s9 = smov [#allocation5]   ;;  %s226_s13 = scalar_lea.hbm %s393_s0, 2048 }
   0x3   :  { %s21_s10 = sshll.u32 %s298_s9, 4  ;;  %p227_p0 = scmp.ne.s32.totalorder %s393_s0, %s226_s13  ;;  %s22_s10 = int_to_ptr.vmem [resolvable:$true] %s21_s10 }
   0x4   :  { %p230_p1 = scmp.lt.u32.totalorder %s226_s13, %s393_s0 }
   0x6   :  { %p232_p2 = pnand %p230_p1, %p227_p0 }
   0x8   :  { %235 = shalt.err (!%p232_p2)
}
   0x9   :  { %s236_s18 = scalar_lea.vmem %s22_s10, 2048  ;;  %p241_p4 = scmp.lt.s32.totalorder %s22_s10, %s22_s10 }
   0xa   :  { %p237_p3 = scmp.ne.s32.totalorder %s22_s10, %s236_s18  ;;  %p242_p5 = scmp.lt.s32.totalorder %s236_s18, %s236_s18 }
   0xc   :  { %p243_p6 = por %p242_p5, %p241_p4 }
   0xe   :  { %p244_p7 = pnand %p243_p6, %p237_p3 }
  0x10   :  { %247 = shalt.err (!%p244_p7)
}
  0x11   :  { %s299_s19 = smov 128   ;;  %s300_s20 = smov 8  }
  0x12   :  { %27 = dma.hbm_to_vmem [thread:$0]  %s393_s0, 2048, %s22_s10, [#allocation6], %s299_s19, %s299_s19, %s300_s20  }
  0x13   :  { %s301_s23 = smov [#allocation8]   ;;  %s248_s27 = scalar_lea.hbm %s394_s1, 16 }
  0x14   :  { %s39_s24 = sshll.u32 %s301_s23, 4  ;;  %p249_p8 = scmp.ne.s32.totalorder %s394_s1, %s248_s27  ;;  %s40_s24 = int_to_ptr.vmem [resolvable:$true] %s39_s24 }
  0x15   :  { %p252_p9 = scmp.lt.u32.totalorder %s248_s27, %s394_s1 }
  0x17   :  { %p254_p10 = pnand %p252_p9, %p249_p8 }
  0x19   :  { %257 = shalt.err (!%p254_p10)
}
  0x1a   :  { %s258_s4 = scalar_lea.vmem %s40_s24, 16  ;;  %s262_s0 = scalar_lea.vmem %s40_s24, 32 }
  0x1b   :  { %p259_p11 = scmp.ne.s32.totalorder %s40_s24, %s258_s4  ;;  %p263_p12 = scmp.lt.s32.totalorder %s40_s24, %s40_s24 }
  0x1c   :  { %p264_p13 = scmp.lt.s32.totalorder %s262_s0, %s258_s4 }
  0x1e   :  { %p265_p0 = por %p264_p13, %p263_p12 }
  0x20   :  { %p266_p1 = pnand %p265_p0, %p259_p11 }
  0x22   :  { %269 = shalt.err (!%p266_p1)
}
  0x23   :  { %42 = dma.hbm_to_vmem [thread:$0]  %s394_s1, 16, %s40_s24, [#allocation9]  }
  0x24   :  { %292 = dma.done.wait [#allocation6], 2048  }
  0x25   :  { %293 = vsyncadd [#allocation6], 4294965248 }
  0x26   :  { %294 = dma.done.wait [#allocation9], 16  }
  0x27   :  { %295 = vsyncadd [#allocation9], 4294967280  ;;  %v119_v0 = vlaneseq  ;;  %v64_v3 = vld [vmem:[#allocation5] sm:$0xff]  ;;  %v65_v5 = vld [vmem:[#allocation5 + $0x8] sm:$0xff]  ;;  %v302_v10 = vmov 0.0   ;;  %vm60_vm2 = vcmask 7168  }
  0x28   :  { %80 = vxpose.xlu0.b32.start [1/16] (narrow) %v64_v3, 8  ;;  %v112_v6 = vld [vmem:[#allocation8] sm:$0x1]  ;;  %v66_v9 = vld [vmem:[#allocation5 + $0x10] sm:$0xff]  ;;  %v67_v12 = vld [vmem:[#allocation5 + $0x18] sm:$0xff]  ;;  %62 = vst.msk [vmem:[#allocation3] sm:$0xff] %vm60_vm2, %v302_v10 }
  0x29   :  { %v345_v1 = vshrl.u32 %v119_v0, 7  ;;  %v347_v2 = vand.u32 127, %v119_v0  ;;  %v68_v13 = vld [vmem:[#allocation5 + $0x20] sm:$0xff]  ;;  %v69_v14 = vld [vmem:[#allocation5 + $0x28] sm:$0xff]  ;;  %v70_v15 = vld [vmem:[#allocation5 + $0x30] sm:$0xff]  ;;  %61 = vst.msk [vmem:[#allocation2] sm:$0xff] %vm60_vm2, %v302_v10 }
  0x2a   :  { %v71_v16 = vld [vmem:[#allocation5 + $0x38] sm:$0xff]  ;;  %v72_v17 = vld [vmem:[#allocation5 + $0x40] sm:$0xff]  ;;  %63 = vst.msk [vmem:[#allocation4] sm:$0xff] %vm60_vm2, %v302_v10  ;;  %v73_v18 = vld [vmem:[#allocation5 + $0x48] sm:$0xff]  ;;  %s303_s1 = smov 1   ;;  %s304_s7 = smov 2  }
  0x2b   :  { %vm138_vm0 = vcmp.lt.s32.totalorder %v347_v2, 16  ;;  %v146_v4 = vsub.s32 0, %v345_v1  ;;  %v74_v19 = vld [vmem:[#allocation5 + $0x50] sm:$0xff]  ;;  %v75_v20 = vld [vmem:[#allocation5 + $0x58] sm:$0xff]  ;;  %v76_v21 = vld [vmem:[#allocation5 + $0x60] sm:$0xff]  ;;  %vm186_vm10 = vcmask 15368  }
  0x2c   :  { %v353_v7 = vsel %vm138_vm0, %v112_v6, 9  ;;  %81 = vxpose.xlu0.b32.cont [2/16] (narrow) %v65_v5, 8  ;;  %v77_v22 = vld [vmem:[#allocation5 + $0x68] sm:$0xff]  ;;  %v78_v23 = vld [vmem:[#allocation5 + $0x70] sm:$0xff]  ;;  %v79_v24 = vld [vmem:[#allocation5 + $0x78] sm:$0xff]  ;;  %s305_s8 = smov [#allocation10]  }
  0x2d   :  { %v160_v8 = vrot.slane %v353_v7, %v146_v4  ;;  %s201_s9 = sshll.u32 %s305_s8, 4  ;;  %vm193_vm11 = vcmask 23568   ;;  %s202_s9 = int_to_ptr.vmem [resolvable:$true] %s201_s9 }
  0x2e   :  { %s270_s10 = scalar_lea.vmem %s202_s9, 128  ;;  %p275_p3 = scmp.lt.s32.totalorder %s202_s9, %s202_s9 }
  0x2f   :  { %vm161_vm1 = vcmp.eq.s32.totalorder %v345_v1, %v160_v8  ;;  %v156_v35 = vld [vmem:[#allocation3] sm:$0xff]  ;;  %p271_p2 = scmp.ne.s32.totalorder %s202_s9, %s270_s10  ;;  %p276_p4 = scmp.lt.s32.totalorder %s270_s10, %s270_s10 }
  0x30   :  { %v216_v11 = vsel %vm161_vm1, 1.0, %v302_v10  ;;  %82 = vxpose.xlu0.b32.cont [3/16] (narrow) %v66_v9, 8  ;;  %v143_v53 = vld [vmem:[#allocation2] sm:$0xff] }
  0x31   :  { %164 = vadd.xlane.f32.xlu1 %v216_v11  ;;  %v168_v48 = vld [vmem:[#allocation4] sm:$0xff]  ;;  %p277_p5 = por %p276_p4, %p275_p3 }
  0x33   :  { %p278_p6 = pnand %p277_p5, %p271_p2 }
  0x34   :  { %83 = vxpose.xlu0.b32.cont [4/16] (narrow) %v67_v12, 8 }
  0x38   :  { %84 = vxpose.xlu0.b32.cont [5/16] (narrow) %v68_v13, 8 }
  0x3c   :  { %85 = vxpose.xlu0.b32.cont [6/16] (narrow) %v69_v14, 8 }
  0x40   :  { %86 = vxpose.xlu0.b32.cont [7/16] (narrow) %v70_v15, 8 }
  0x44   :  { %87 = vxpose.xlu0.b32.cont [8/16] (narrow) %v71_v16, 8 }
  0x48   :  { %88 = vxpose.xlu0.b32.cont [9/16] (narrow) %v72_v17, 8 }
  0x4c   :  { %89 = vxpose.xlu0.b32.cont [10/16] (narrow) %v73_v18, 8 }
  0x50   :  { %90 = vxpose.xlu0.b32.cont [11/16] (narrow) %v74_v19, 8 }
  0x54   :  { %91 = vxpose.xlu0.b32.cont [12/16] (narrow) %v75_v20, 8 }
  0x58   :  { %92 = vxpose.xlu0.b32.cont [13/16] (narrow) %v76_v21, 8 }
  0x5c   :  { %93 = vxpose.xlu0.b32.cont [14/16] (narrow) %v77_v22, 8 }
  0x60   :  { %94 = vxpose.xlu0.b32.cont [15/16] (narrow) %v78_v23, 8 }
  0x64   :  { %95 = vxpose.xlu0.b32.end [16/16] (narrow) %v79_v24, 8 }
  0xa8   :  { %v96_v25 = vpop.trf.xlu0 }
  0xa9   :  { %v113_v26 = vrot.slane %v96_v25, 4 }
  0xab   :  { %v114_v27 = vmax.f32 %v96_v25, %v113_v26 }
  0xad   :  { %v115_v28 = vrot.slane %v114_v27, 2 }
  0xaf   :  { %v116_v29 = vmax.f32 %v114_v27, %v115_v28 }
  0xb1   :  { %v117_v30 = vrot.slane %v116_v29, 1 }
  0xb3   :  { %v118_v31 = vmax.f32 %v116_v29, %v117_v30 }
  0xb5   :  { %vm121_vm3 = vcmp.ge.f32.partialorder %v96_v25, %v118_v31 }
  0xb6   :  { %v122_v32 = vsel %vm121_vm3, %v345_v1, 8 }
  0xb7   :  { %v123_v33 = vrot.slane %v122_v32, 4 }
  0xb9   :  { %vm124_vm4 = vcmp.lt.s32.totalorder %v122_v32, %v123_v33 }
  0xba   :  { %v125_v34 = vsel %vm124_vm4, %v122_v32, %v123_v33 }
  0xbb   :  { %v126_v36 = vrot.slane %v125_v34, 2 }
  0xbd   :  { %vm127_vm5 = vcmp.lt.s32.totalorder %v125_v34, %v126_v36 }
  0xbe   :  { %v165_v37 = vpop.xlane.xlu1 %164  ;;  %v128_v39 = vsel %vm127_vm5, %v125_v34, %v126_v36 }
  0xbf   :  { %v166_v38 = vadd.f32 %v165_v37, %v156_v35  ;;  %v129_v40 = vrot.slane %v128_v39, 1 }
  0xc1   :  { %167 = vst.msk [vmem:[#allocation3] sm:$0xff] %vm60_vm2, %v166_v38  ;;  %vm130_vm6 = vcmp.lt.s32.totalorder %v128_v39, %v129_v40 }
  0xc2   :  { %v131_v41 = vsel %vm130_vm6, %v128_v39, %v129_v40 }
  0xc3   :  { %v139_v42 = vsel %vm138_vm0, %v131_v41, 9 }
  0xc4   :  { %vm169_vm7 = vcmp.eq.s32.totalorder %v345_v1, %v139_v42  ;;  %vm141_vm8 = vcmp.eq.s32.totalorder %v139_v42, %v353_v7 }
  0xc5   :  { %v217_v43 = vsel %vm169_vm7, 1.0, %v302_v10  ;;  %v142_v45 = vsel %vm141_vm8, %v353_v7, 9 }
  0xc6   :  { %172 = vadd.xlane.f32.xlu1 %v217_v43  ;;  %v147_v46 = vrot.slane %v142_v45, %v146_v4 }
  0xc8   :  { %v181_v44 = vld [vmem:[#allocation3] sm:$0xff]  ;;  %vm148_vm9 = vcmp.eq.s32.totalorder %v345_v1, %v147_v46 }
  0xc9   :  { %v215_v47 = vsel %vm148_vm9, 1.0, %v302_v10 }
  0xd7   :  { %183 = vrot.lane.b32.xlu1 %v181_v44, %s303_s1 }
  0xfb   :  { %151 = vadd.xlane.f32.xlu1 %v215_v47 }
 0x153   :  { %v173_v49 = vpop.xlane.xlu1 %172 }
 0x154   :  { %v174_v50 = vadd.f32 %v173_v49, %v168_v48 }
 0x156   :  { %175 = vst.msk [vmem:[#allocation4] sm:$0xff] %vm60_vm2, %v174_v50 }
 0x157   :  { %v184_v52 = vpop.permute.xlu1 %183 }
 0x15d   :  { %v188_v51 = vld [vmem:[#allocation4] sm:$0xff] }
 0x15e   :  { %190 = vrot.lane.b32.xlu1 %v188_v51, %s304_s7 }
 0x188   :  { %v152_v54 = vpop.xlane.xlu1 %151 }
 0x189   :  { %v153_v55 = vadd.f32 %v152_v54, %v143_v53 }
 0x18b   :  { %155 = vst.msk [vmem:[#allocation2] sm:$0xff] %vm60_vm2, %v153_v55 }
 0x192   :  { %v179_v56 = vld [vmem:[#allocation2] sm:$0xff] }
 0x193   :  { %180 = vst.msk [vmem:[#allocation10] sm:$0xff] %vm60_vm2, %v179_v56 }
 0x194   :  { %187 = vst.msk [vmem:[#allocation10] sm:$0xff] %vm186_vm10, %v184_v52 }
 0x1d0   :  { %v191_v57 = vpop.permute.xlu1 %190 }
 0x1d1   :  { %194 = vst.msk [vmem:[#allocation10] sm:$0xff] %vm193_vm11, %v191_v57 }
 0x1d2   :  { %281 = shalt.err (!%p278_p6)
}
 0x1d3   :  { %s282_s13 = scalar_lea.hbm %s395_s2, 128 }
 0x1d4   :  { %p283_p7 = scmp.ne.s32.totalorder %s395_s2, %s282_s13  ;;  %p286_p8 = scmp.lt.u32.totalorder %s282_s13, %s395_s2 }
 0x1d6   :  { %p288_p9 = pnand %p286_p8, %p283_p7 }
 0x1d8   :  { %291 = shalt.err (!%p288_p9)
}
 0x1d9   :  { %204 = dma.vmem_to_hbm [thread:$0]  %s202_s9, 128, %s395_s2, [#allocation7]  }
 0x1da   :  { %296 = dma.done.wait [#allocation7], 128  }
 0x1db   :  { %297 = vsyncadd [#allocation7], 4294967168 }
 0x1dc   :  { %208 = vsyncpa [#allocation6], 1 }
 0x1dd   :  { %209 = vsyncpa [#allocation9], 1 }
 0x1de   :  { %210 = vsyncpa [#allocation7], 1 }

</bundles_post_ra>
